<compile_context>
chip_gen: v6e
topology: v6e:2x2x1
jax: 0.10.0
libtpu: 0.0.40
codegen_flags: <defaults>
</compile_context>

<pallas_src>
import functools

import jax
import jax.numpy as jnp
from jax import lax
from jax.experimental import pallas as pl
from jax.experimental.pallas import tpu as pltpu


def rmsnorm_kernel(x_ref, w_ref, o_ref, *, eps, inv_dim):
    # x_ref: (block_rows, dim_padded) tile in VMEM; w_ref: (1, dim_padded) weight.
    x = x_ref[...].astype(jnp.float32)
    w = w_ref[...].astype(jnp.float32)
    # Sum of squares over the (possibly zero-padded) feature axis divided by the true
    # feature count: padded columns are zero so they contribute nothing to the sum.
    ms = jnp.sum(x * x, axis=-1, keepdims=True) * inv_dim
    # rsqrt goes to the EUP slot; normalization is a single broadcast multiply (VPU).
    inv_rms = lax.rsqrt(ms + eps)
    o_ref[...] = (w * (x * inv_rms)).astype(o_ref.dtype)


def _tpu_generation_budgets():
    """Return (vmem_limit_bytes, tile_budget_bytes) tuned per TPU generation."""
    vmem_cap = None
    try:
        info = pltpu.get_tpu_info()
        vmem_cap = getattr(info, "vmem_capacity_bytes", None)
    except Exception:
        vmem_cap = None
    kind = ""
    try:
        kind = jax.devices()[0].device_kind.lower()
    except Exception:
        pass
    if vmem_cap is None:
        vmem_cap = 64 << 20  # conservative: assume the smallest (v7x-sized) VMEM
    if vmem_cap <= (64 << 20):
        # v7x: 64 MiB per TC -> leave headroom for weight buffers / compiler scratch.
        vmem_limit = 40 << 20
    elif ("v5 lite" in kind) or ("v5e" in kind) or ("v5litepod" in kind):
        # v5e: slow HBM already hides per-step overhead at modest tiles.
        vmem_limit = 32 << 20
    else:
        # v6e and other 128 MiB parts: plenty of headroom for large streaming tiles.
        vmem_limit = 64 << 20
    tile_budget = int(vmem_limit * 0.65)
    return vmem_limit, tile_budget


def _choose_block_rows(rows, dim, in_itemsize, out_itemsize, tile_budget_bytes,
                       max_block_rows=2048):
    """Largest sublane-aligned row tile fitting the budget, with >=2-4 grid steps."""
    _cdiv = lambda a, b: -(-a // b)
    # sublane alignment: 8 rows for 4-byte dtypes, 16 for 2-byte (bf16 packing)
    sub = 8 if max(in_itemsize, out_itemsize) >= 4 else 16
    # double-buffered input + output tiles, plus ~one f32 working copy of the tile
    per_row = dim * (2 * (in_itemsize + out_itemsize) + 4)
    br = int(tile_budget_bytes // max(per_row, 1))
    br = max(min(br, max_block_rows), sub)
    if rows > 2 * sub:
        # Guarantee >=~4 grid steps so pipelining engages and both v7x TCs stay busy.
        quarter = max((rows // 4) // sub * sub, sub)
        br = min(br, quarter)
    else:
        br = min(br, rows)
    br = max((br // sub) * sub, min(sub, rows))
    br = max(br, 1)
    # Best-effort: prefer an even number of grid steps (v7x has 2 TensorCores).
    steps = _cdiv(rows, br)
    if steps > 1 and steps % 2 == 1:
        br_even = _cdiv(rows, steps + 1)
        br_even = _cdiv(br_even, sub) * sub
        if br_even >= 1 and _cdiv(rows, br_even) % 2 == 0:
            br = br_even
    return br


def rms_norm(x, weight, eps=1e-8, block_rows=None):
    """RMSNorm over the last axis of x, matching the PyTorch reference.

    x: any shape (..., dim), weight: (dim,).
    """
    orig_shape = x.shape
    dim = orig_shape[-1]
    x2d = x.reshape(-1, dim)
    rows = x2d.shape[0]

    # Lane-dense feature axis: pad dim up to a multiple of 128 when the extra HBM
    # traffic is modest (<=1.5x). Padded weight columns are zero and the kernel divides
    # by the true dim, so results are bit-identical to the unpadded computation.
    LANE = 128
    dim_p = -(-dim // LANE) * LANE
    pad = dim_p - dim
    if pad and dim_p <= 1.5 * dim:
        x2d = jnp.pad(x2d, ((0, 0), (0, pad)))
        w2d = jnp.pad(weight.reshape(1, dim), ((0, 0), (0, pad)))
    else:
        dim_p, pad = dim, 0
        w2d = weight.reshape(1, dim)

    vmem_limit, tile_budget = _tpu_generation_budgets()
    if block_rows is None:
        block_rows = _choose_block_rows(
            rows, dim_p, x.dtype.itemsize, x.dtype.itemsize, tile_budget)
    block_rows = min(block_rows, rows)

    grid = (pl.cdiv(rows, block_rows),)

    # TODO(synk): optionally sweep pipeline_mode=pl.Buffered(3) on the x in_spec on v7x
    # (shorter per-tile DMA exposes step overhead); omitted to keep VMEM accounting simple.
    out = pl.pallas_call(
        functools.partial(rmsnorm_kernel, eps=float(eps), inv_dim=1.0 / dim),
        out_shape=jax.ShapeDtypeStruct((rows, dim_p), x.dtype),
        grid_spec=pltpu.PrefetchScalarGridSpec(
            num_scalar_prefetch=0,
            grid=grid,
            in_specs=[
                pl.BlockSpec((block_rows, dim_p), lambda i: (i, 0)),
                pl.BlockSpec((1, dim_p), lambda i: (0, 0)),
            ],
            out_specs=pl.BlockSpec((block_rows, dim_p), lambda i: (i, 0)),
        ),
        compiler_params=pltpu.CompilerParams(
            dimension_semantics=("parallel",),
            vmem_limit_bytes=vmem_limit,
        ),
    )(x2d, w2d)

    if pad:
        out = out[:, :dim]
    return out.reshape(orig_shape)


def _ref_rms_norm(x, wt, eps):
    rms = jnp.sqrt(jnp.mean(x * x, axis=-1, keepdims=True) + eps)
    return wt * (x / rms)


if __name__ == "__main__":
    key = jax.random.PRNGKey(0)
    batch, seq, hidden = 2, 8, 32
    x = jax.random.normal(key, (batch, seq, hidden), dtype=jnp.float32)
    # deterministic parameter init: PyTorch inits wt = ones(dim)
    wt = jnp.ones((hidden,), dtype=jnp.float32)

    y = jax.block_until_ready(rms_norm(x, wt, eps=1e-8))
    y_ref = _ref_rms_norm(x, wt, 1e-8)
    assert y.shape == x.shape
    assert jnp.allclose(y, y_ref, atol=1e-5, rtol=1e-5)

    # Ragged-grid check: rows (15) not a multiple of block_rows (8) — exercises
    # Pallas' masked writeback on the tail block instead of wrapper-side padding.
    x2 = jax.random.normal(jax.random.PRNGKey(1), (3, 5, hidden), dtype=jnp.float32)
    y2 = jax.block_until_ready(rms_norm(x2, wt, eps=1e-8, block_rows=8))
    y2_ref = _ref_rms_norm(x2, wt, 1e-8)
    assert y2.shape == x2.shape
    assert jnp.allclose(y2, y2_ref, atol=1e-5, rtol=1e-5)

    # Lane-dense padding path: dim=192 (not a multiple of 128) pads to 256 inside the
    # wrapper; non-trivial weights check the padded-weight / true-dim normalization.
    dim3 = 192
    x3 = jax.random.normal(jax.random.PRNGKey(2), (4, 8, dim3), dtype=jnp.float32)
    wt3 = 0.5 + jax.random.uniform(jax.random.PRNGKey(3), (dim3,), dtype=jnp.float32)
    y3 = jax.block_until_ready(rms_norm(x3, wt3, eps=1e-8))
    y3_ref = _ref_rms_norm(x3, wt3, 1e-8)
    assert y3.shape == x3.shape
    assert jnp.allclose(y3, y3_ref, atol=1e-5, rtol=1e-5)

    print("KERNEL_OK")
</pallas_src>

<mosaic_0001>
module attributes {stable_mosaic.version = 11 : i64} {
  func.func @rmsnorm_kernel(%arg0: i32, %arg1: memref<16x32xf32, #tpu.memory_space<vmem>>, %arg2: memref<1x32xf32, #tpu.memory_space<vmem>>, %arg3: memref<16x32xf32, #tpu.memory_space<vmem>>) attributes {dimension_semantics = [#tpu.dimension_semantics<parallel>], iteration_bounds = array<i64: 1>, scalar_prefetch = 0 : i64, scratch_operands = 0 : i64, tpu.core_type = #tpu.core_type<tc>, window_params = [{transform_indices = @transform_0, window_bounds = array<i64: 16, 32>}, {pipeline_mode = #tpu.pipeline_mode<synchronous>, transform_indices = @transform_1, window_bounds = array<i64: 1, 32>}, {transform_indices = @transform_2, window_bounds = array<i64: 16, 32>}]} {
    %c0 = arith.constant 0 : index
    %c0_0 = arith.constant 0 : index
    %0 = vector.load %arg1[%c0, %c0_0] : memref<16x32xf32, #tpu.memory_space<vmem>>, vector<16x32xf32>
    %c0_1 = arith.constant 0 : index
    %c0_2 = arith.constant 0 : index
    %1 = vector.load %arg2[%c0_1, %c0_2] : memref<1x32xf32, #tpu.memory_space<vmem>>, vector<1x32xf32>
    %2 = arith.mulf %0, %0 : vector<16x32xf32>
    %cst = arith.constant dense<0.000000e+00> : vector<16xf32>
    %3 = vector.multi_reduction <add>, %2, %cst [1] : vector<16x32xf32> to vector<16xf32>
    %4 = vector.shape_cast %3 : vector<16xf32> to vector<16x1xf32>
    %cst_3 = arith.constant 3.125000e-02 : f32
    %5 = vector.broadcast %cst_3 : f32 to vector<16x1xf32>
    %6 = arith.mulf %4, %5 : vector<16x1xf32>
    %cst_4 = arith.constant 9.99999993E-9 : f32
    %7 = vector.broadcast %cst_4 : f32 to vector<16x1xf32>
    %8 = arith.addf %6, %7 : vector<16x1xf32>
    %9 = math.rsqrt %8 : vector<16x1xf32>
    %10 = vector.broadcast %9 : vector<16x1xf32> to vector<16x32xf32>
    %11 = arith.mulf %0, %10 : vector<16x32xf32>
    %12 = vector.broadcast %1 : vector<1x32xf32> to vector<16x32xf32>
    %13 = arith.mulf %12, %11 : vector<16x32xf32>
    %c0_5 = arith.constant 0 : index
    %c0_6 = arith.constant 0 : index
    %14 = vector.load %arg3[%c0_5, %c0_6] : memref<16x32xf32, #tpu.memory_space<vmem>>, vector<16x32xf32>
    tpu.vector_store %arg3[%c0_5, %c0_6], %13 {strides = array<i32>} : memref<16x32xf32, #tpu.memory_space<vmem>>, vector<16x32xf32>,
    return
  }
  func.func @transform_0(%arg0: i32) -> (i32, i32) {
    %c0_i32 = arith.constant 0 : i32
    %c0_i32_0 = arith.constant 0 : i32
    return %arg0, %c0_i32 : i32, i32
  }
  func.func @transform_1(%arg0: i32) -> (i32, i32) {
    %c0_i32 = arith.constant 0 : i32
    %c0_i32_0 = arith.constant 0 : i32
    %c0_i32_1 = arith.constant 0 : i32
    return %c0_i32, %c0_i32_0 : i32, i32
  }
  func.func @transform_2(%arg0: i32) -> (i32, i32) {
    %c0_i32 = arith.constant 0 : i32
    %c0_i32_0 = arith.constant 0 : i32
    return %arg0, %c0_i32 : i32, i32
  }
}

</mosaic_0001>

<bundles_post_ra>
// kernel: tpu_custom_call.1
= control target key start
LH: loop header
LB: loop body
LE: loop exit
PB: predicated region body
PF: predicated region fallthrough
CT: control target
= control target key end

     0   :  { %7 = vsyncpa [#allocation3], 0  ;;  %s164_s0 = inlined_call_operand.hbm [shape: f32[16,32], index: 0, kind: input, shape index: {}]   ;;  %s165_s1 = inlined_call_operand.vmem [shape: f32[1,32], index: 1, kind: input, shape index: {}]   ;;  %s166_s2 = inlined_call_operand.hbm [shape: f32[16,32], index: 2, kind: output, shape index: {}]  }
   0x1   :  { %8 = vsyncpa [#allocation4], 0  ;;  %s126_s9 = smov [#allocation2]  }
   0x2   :  { %s14_s10 = sshll.u32 %s126_s9, 4  ;;  %s15_s10 = int_to_ptr.vmem [resolvable:$true] %s14_s10 }
   0x3   :  { %s90_s11 = scalar_lea.vmem %s15_s10, 256  ;;  %p95_p1 = scmp.lt.s32.totalorder %s15_s10, %s15_s10 }
   0x4   :  { %p91_p0 = scmp.ne.s32.totalorder %s15_s10, %s90_s11  ;;  %p96_p2 = scmp.lt.s32.totalorder %s90_s11, %s90_s11 }
   0x6   :  { %p97_p3 = por %p96_p2, %p95_p1 }
   0x8   :  { %p98_p4 = pnand %p97_p3, %p91_p0 }
   0xa   :  { %101 = shalt.err (!%p98_p4)
}
   0xb   :  { %s127_s12 = smov 128   ;;  %s128_s13 = smov 8  }
   0xc   :  { %20 = dma.hbm_to_vmem [thread:$0]  %s164_s0, 256, %s15_s10, [#allocation3], %s127_s12, %s127_s12, %s128_s13  }
   0xd   :  { %122 = dma.done.wait [#allocation3], 256  }
   0xe   :  { %123 = vsyncadd [#allocation3], 4294967040  ;;  %v26_v0 = vld [vmem:[#allocation2] sm:$0xff]  ;;  %vm31_vm0 = vcmask 261120   ;;  %v27_v1 = vld [vmem:[#allocation2 + $0x8] sm:$0xff]  ;;  %s129_s17 = smov [#allocation5]  }
   0xf   :  { %v29_v2 = vmul.f32 %v26_v0, %v26_v0  ;;  %v30_v3 = vmul.f32 %v27_v1, %v27_v1  ;;  %v73_v13 = vld [vmem:[%s165_s1] ss:$0 sm:$0xff]  ;;  %s61_s18 = sshll.u32 %s129_s17, 4  ;;  %s62_s18 = int_to_ptr.vmem [resolvable:$true] %s61_s18 }
  0x10   :  { %s102_s19 = scalar_lea.vmem %s62_s18, 256  ;;  %p107_p6 = scmp.lt.s32.totalorder %s62_s18, %s62_s18 }
  0x11   :  { %v32_v4 = vsel %vm31_vm0, %v29_v2, 0.0  ;;  %v35_v5 = vsel %vm31_vm0, %v30_v3, 0.0  ;;  %p103_p5 = scmp.ne.s32.totalorder %s62_s18, %s102_s19  ;;  %p108_p7 = scmp.lt.s32.totalorder %s102_s19, %s102_s19 }
  0x12   :  { %33 = vadd.xlane.f32.xlu0 %v32_v4 }
  0x13   :  { %p109_p8 = por %p108_p7, %p107_p6 }
  0x15   :  { %p110_p9 = pnand %p109_p8, %p103_p5 }
  0x16   :  { %36 = vadd.xlane.f32.xlu0 %v35_v5 }
  0x9b   :  { %v34_v6 = vpop.xlane.xlu0 %33 }
  0x9c   :  { %v38_v7 = vmul.f32 0.03125, %v34_v6 }
  0x9e   :  { %v40_v8 = vadd.f32 1e-08, %v38_v7 }
  0x9f   :  { %v37_v9 = vpop.xlane.xlu0 %36 }
  0xa0   :  { %78 = vrsqrt.f32 %v40_v8  ;;  %v39_v10 = vmul.f32 0.03125, %v37_v9 }
  0xa2   :  { %v41_v11 = vadd.f32 1e-08, %v39_v10 }
  0xa4   :  { %80 = vrsqrt.f32 %v41_v11 }
  0xad   :  { %v79_v12 = vpop.eup %78 }
  0xae   :  { %v44_v14 = vmul.f32 %v79_v12, %v26_v0 }
  0xb0   :  { %v52_v15 = vmul.f32 %v73_v13, %v44_v14 }
  0xb1   :  { %v81_v16 = vpop.eup %80 }
  0xb2   :  { %v45_v17 = vmul.f32 %v81_v16, %v27_v1  ;;  %54 = vst.msk [vmem:[#allocation5] sm:$0xff] %vm31_vm0, %v52_v15 }
  0xb4   :  { %v53_v18 = vmul.f32 %v73_v13, %v45_v17 }
  0xb6   :  { %55 = vst.msk [vmem:[#allocation5 + $0x8] sm:$0xff] %vm31_vm0, %v53_v18 }
  0xb7   :  { %113 = shalt.err (!%p110_p9)
}
  0xb8   :  { %67 = dma.vmem_to_hbm [thread:$0]  %s62_s18, 256, %s166_s2, [#allocation4], %s127_s12, %s127_s12, %s128_s13  }
  0xb9   :  { %124 = dma.done.wait [#allocation4], 256  }
  0xba   :  { %125 = vsyncadd [#allocation4], 4294967040 }
  0xbb   :  { %71 = vsyncpa [#allocation3], 1 }
  0xbc   :  { %72 = vsyncpa [#allocation4], 1 }

</bundles_post_ra>
